<compile_context>
chip_gen: v5e
topology: v5e:2x2
jax: 0.10.0
libtpu: 0.0.40
codegen_flags: <defaults>
</compile_context>

<pallas_src>
import functools

import jax
import jax.numpy as jnp
from jax.experimental import pallas as pl
from jax.experimental.pallas import tpu as pltpu


def _linear_tanh_kernel(x_ref, w_ref, b_ref, y_ref, yt_ref):
    # x_ref: (B, D_in) whole input; w_ref: (D_in, TN) bf16 weight tile;
    # b_ref: (1, TN) f32 bias tile.  Accumulate in f32 on the MXU.
    x = x_ref[...].astype(jnp.bfloat16)
    y = jnp.dot(x, w_ref[...], preferred_element_type=jnp.float32)
    y = y + b_ref[...]
    y_ref[...] = y.astype(y_ref.dtype)
    yt_ref[...] = jnp.tanh(y).astype(yt_ref.dtype)


def _linear_kernel(x_ref, w_ref, b_ref, y_ref):
    x = x_ref[...].astype(jnp.bfloat16)
    y = jnp.dot(x, w_ref[...], preferred_element_type=jnp.float32)
    y_ref[...] = (y + b_ref[...]).astype(y_ref.dtype)


def _default_tile_n(d_out):
    """Single grid step on 1-TC chips; 2 parallel steps on v7x (2 TCs)."""
    try:
        kind = jax.devices()[0].device_kind.lower()
    except Exception:
        kind = ""
    two_cores = ("v7" in kind) or ("7x" in kind)
    if two_cores and d_out % (2 * 128) == 0:
        return d_out // 2
    return d_out


@functools.partial(jax.jit, static_argnames=("tn", "with_tanh"))
def linear_pallas(x, w_t, b2d, *, tn, with_tanh):
    """y = x @ w_t + b. Returns (y, tanh(y)) if with_tanh else (y,).

    w_t is the pre-transposed weight with shape (D_in, D_out), bf16.
    """
    batch, d_in = x.shape
    d_out = w_t.shape[1]
    assert d_out % tn == 0 and tn % 128 == 0

    grid = (d_out // tn,)

    in_specs = [
        pl.BlockSpec((batch, d_in), lambda j: (0, 0)),   # x (whole, tiny)
        pl.BlockSpec((d_in, tn), lambda j: (0, j)),      # weight tile (bf16)
        pl.BlockSpec((1, tn), lambda j: (0, j)),         # bias tile (f32)
    ]

    flops = 2 * batch * d_in * d_out
    in_bytes = x.size * x.dtype.itemsize + w_t.size * 2 + b2d.size * 4
    out_bytes = batch * d_out * 4 * (2 if with_tanh else 1)
    cost = pl.CostEstimate(
        flops=flops,
        transcendentals=(batch * d_out if with_tanh else 0),
        bytes_accessed=in_bytes + out_bytes,
    )

    if with_tanh:
        out_shape = (
            jax.ShapeDtypeStruct((batch, d_out), jnp.float32),
            jax.ShapeDtypeStruct((batch, d_out), jnp.float32),
        )
        out_specs = [
            pl.BlockSpec((batch, tn), lambda j: (0, j)),
            pl.BlockSpec((batch, tn), lambda j: (0, j)),
        ]
        kernel = _linear_tanh_kernel
    else:
        out_shape = jax.ShapeDtypeStruct((batch, d_out), jnp.float32)
        out_specs = pl.BlockSpec((batch, tn), lambda j: (0, j))
        kernel = _linear_kernel

    out = pl.pallas_call(
        kernel,
        out_shape=out_shape,
        grid_spec=pltpu.PrefetchScalarGridSpec(
            num_scalar_prefetch=0,
            grid=grid,
            in_specs=in_specs,
            out_specs=out_specs,
        ),
        compiler_params=pltpu.CompilerParams(
            dimension_semantics=("parallel",)
        ),
        cost_estimate=cost,
    )(x, w_t, b2d)
    return out if with_tanh else (out,)


class MatrixPallas:
    """JAX/Pallas port of the PyTorch Matrix module."""

    def __init__(self, input_dimension, output_dimension,
                 intermediate_dimension, non_linearity=False,
                 channel_dimension=1, key=None):
        assert output_dimension == channel_dimension * 64 * 64, (
            "forward() views the linear output as (B, C, 64, 64)")
        self.input_dimension = input_dimension
        self.output_dimension = output_dimension
        self.intermediate_dimension = intermediate_dimension
        self.non_linearity = non_linearity
        self.channel_dimension = channel_dimension

        if key is None:
            key = jax.random.PRNGKey(0)
        kw, kb = jax.random.split(key)
        # Deterministic init mimicking nn.Linear default: U(-1/sqrt(in), 1/sqrt(in))
        bound = 1.0 / (input_dimension ** 0.5)
        # Stored pre-transposed (D_in, D_out), cast once to bf16 (MXU-native,
        # halves the dominant HBM traffic). Bias kept in f32.
        self.weight_t = jax.random.uniform(
            kw, (input_dimension, output_dimension),
            dtype=jnp.float32, minval=-bound, maxval=bound
        ).astype(jnp.bfloat16)
        self.bias = jax.random.uniform(
            kb, (output_dimension,),
            dtype=jnp.float32, minval=-bound, maxval=bound)
        self._bias2d = self.bias.reshape(1, output_dimension)
        self._tn = _default_tile_n(output_dimension)

    def __call__(self, x):
        batch = x.shape[0]
        img_shape = (batch, self.channel_dimension, 64, 64)
        if self.non_linearity:
            y, y_tanh = linear_pallas(
                x, self.weight_t, self._bias2d, tn=self._tn, with_tanh=True)
            ep_img = y_tanh.reshape(img_shape)
            ep_img_lin = y.reshape(img_shape)
            return ep_img, ep_img_lin
        else:
            (y,) = linear_pallas(
                x, self.weight_t, self._bias2d, tn=self._tn, with_tanh=False)
            ep_img = y.reshape(img_shape)
            return ep_img, ep_img


if __name__ == "__main__":
    key = jax.random.PRNGKey(0)
    k_in, k_mod = jax.random.split(key)

    batch = 2
    input_dim = 32
    channel_dim = 1
    output_dim = channel_dim * 64 * 64  # 4096, required by .view(B, C, 64, 64)

    x = jax.random.normal(k_in, (batch, input_dim), dtype=jnp.float32)

    # --- non_linearity=True branch ---
    model = MatrixPallas(
        input_dimension=input_dim,
        output_dimension=output_dim,
        intermediate_dimension=64,
        non_linearity=True,
        channel_dimension=channel_dim,
        key=k_mod,
    )
    ep_img, ep_img_lin = model(x)
    jax.block_until_ready((ep_img, ep_img_lin))

    # Reference computed the same way (bf16 operands, f32 accumulation).
    y_ref = jnp.dot(x.astype(jnp.bfloat16), model.weight_t,
                    preferred_element_type=jnp.float32) + model.bias
    ref_lin = y_ref.reshape(batch, channel_dim, 64, 64)
    ref_img = jnp.tanh(y_ref).reshape(batch, channel_dim, 64, 64)
    assert ep_img.shape == (batch, channel_dim, 64, 64)
    assert ep_img_lin.shape == (batch, channel_dim, 64, 64)
    assert jnp.allclose(ep_img_lin, ref_lin, atol=1e-3, rtol=1e-3)
    assert jnp.allclose(ep_img, ref_img, atol=1e-3, rtol=1e-3)

    # --- non_linearity=False branch (single output, no tanh writeback) ---
    model_lin = MatrixPallas(
        input_dimension=input_dim,
        output_dimension=output_dim,
        intermediate_dimension=64,
        non_linearity=False,
        channel_dimension=channel_dim,
        key=k_mod,
    )
    a_img, b_img = model_lin(x)
    jax.block_until_ready((a_img, b_img))
    assert jnp.allclose(a_img, ref_lin, atol=1e-3, rtol=1e-3)
    assert jnp.allclose(b_img, ref_lin, atol=1e-3, rtol=1e-3)

    print("KERNEL_OK")
</pallas_src>

<mosaic_0001>
module attributes {stable_mosaic.version = 11 : i64} {
  func.func @_linear_tanh_kernel(%arg0: i32, %arg1: memref<2x32xf32, #tpu.memory_space<vmem>>, %arg2: memref<32x4096xbf16, #tpu.memory_space<vmem>>, %arg3: memref<1x4096xf32, #tpu.memory_space<vmem>>, %arg4: memref<2x4096xf32, #tpu.memory_space<vmem>>, %arg5: memref<2x4096xf32, #tpu.memory_space<vmem>>) attributes {dimension_semantics = [#tpu.dimension_semantics<parallel>], iteration_bounds = array<i64: 1>, scalar_prefetch = 0 : i64, scratch_operands = 0 : i64, tpu.core_type = #tpu.core_type<tc>, window_params = [{pipeline_mode = #tpu.pipeline_mode<synchronous>, transform_indices = @transform_0, window_bounds = array<i64: 2, 32>}, {transform_indices = @transform_1, window_bounds = array<i64: 32, 4096>}, {transform_indices = @transform_2, window_bounds = array<i64: 1, 4096>}, {transform_indices = @transform_3, window_bounds = array<i64: 2, 4096>}, {transform_indices = @transform_4, window_bounds = array<i64: 2, 4096>}]} {
    %c0 = arith.constant 0 : index
    %c0_0 = arith.constant 0 : index
    %0 = vector.load %arg1[%c0, %c0_0] : memref<2x32xf32, #tpu.memory_space<vmem>>, vector<2x32xf32>
    %1 = arith.truncf %0 : vector<2x32xf32> to vector<2x32xbf16>
    %c0_1 = arith.constant 0 : index
    %c0_2 = arith.constant 0 : index
    %2 = vector.load %arg2[%c0_1, %c0_2] : memref<32x4096xbf16, #tpu.memory_space<vmem>>, vector<32x4096xbf16>
    %cst = arith.constant dense<0.000000e+00> : vector<2x4096xf32>
    %3 = tpu.matmul %1, %2, %cst {dimension_numbers = #tpu.dot_dimension_numbers<[1], [0], [0], [1], [0, 0, 1, 1], [], []>} : vector<2x32xbf16>, vector<32x4096xbf16>, vector<2x4096xf32> -> vector<2x4096xf32>
    %c0_3 = arith.constant 0 : index
    %c0_4 = arith.constant 0 : index
    %4 = vector.load %arg3[%c0_3, %c0_4] : memref<1x4096xf32, #tpu.memory_space<vmem>>, vector<1x4096xf32>
    %5 = vector.broadcast %4 : vector<1x4096xf32> to vector<2x4096xf32>
    %6 = arith.addf %3, %5 : vector<2x4096xf32>
    %c0_5 = arith.constant 0 : index
    %c0_6 = arith.constant 0 : index
    %7 = vector.load %arg4[%c0_5, %c0_6] : memref<2x4096xf32, #tpu.memory_space<vmem>>, vector<2x4096xf32>
    tpu.vector_store %arg4[%c0_5, %c0_6], %6 {strides = array<i32>} : memref<2x4096xf32, #tpu.memory_space<vmem>>, vector<2x4096xf32>,
    %8 = math.tanh %6 : vector<2x4096xf32>
    %c0_7 = arith.constant 0 : index
    %c0_8 = arith.constant 0 : index
    %9 = vector.load %arg5[%c0_7, %c0_8] : memref<2x4096xf32, #tpu.memory_space<vmem>>, vector<2x4096xf32>
    tpu.vector_store %arg5[%c0_7, %c0_8], %8 {strides = array<i32>} : memref<2x4096xf32, #tpu.memory_space<vmem>>, vector<2x4096xf32>,
    return
  }
  func.func @transform_0(%arg0: i32) -> (i32, i32) {
    %c0_i32 = arith.constant 0 : i32
    %c0_i32_0 = arith.constant 0 : i32
    %c0_i32_1 = arith.constant 0 : i32
    return %c0_i32, %c0_i32_0 : i32, i32
  }
  func.func @transform_1(%arg0: i32) -> (i32, i32) {
    %c0_i32 = arith.constant 0 : i32
    %c0_i32_0 = arith.constant 0 : i32
    return %c0_i32, %arg0 : i32, i32
  }
  func.func @transform_2(%arg0: i32) -> (i32, i32) {
    %c0_i32 = arith.constant 0 : i32
    %c0_i32_0 = arith.constant 0 : i32
    return %c0_i32, %arg0 : i32, i32
  }
  func.func @transform_3(%arg0: i32) -> (i32, i32) {
    %c0_i32 = arith.constant 0 : i32
    %c0_i32_0 = arith.constant 0 : i32
    return %c0_i32, %arg0 : i32, i32
  }
  func.func @transform_4(%arg0: i32) -> (i32, i32) {
    %c0_i32 = arith.constant 0 : i32
    %c0_i32_0 = arith.constant 0 : i32
    return %c0_i32, %arg0 : i32, i32
  }
}

</mosaic_0001>

<bundles_post_ra>
// kernel: linear_pallas.1
= control target key start
LH: loop header
LB: loop body
LE: loop exit
PB: predicated region body
PF: predicated region fallthrough
CT: control target
= control target key end

     0   :  { %10 = vsyncpa [#allocation3], 0  ;;  %s1943_s0 = inlined_call_operand.hbm [shape: f32[2,32], index: 0, kind: input, shape index: {}]   ;;  %s1944_s1 = inlined_call_operand.hbm [shape: bf16[32,4096], index: 1, kind: input, shape index: {}]   ;;  %s1945_s2 = inlined_call_operand.hbm [shape: f32[1,4096], index: 2, kind: input, shape index: {}]   ;;  %s1946_s3 = inlined_call_operand.hbm [shape: f32[2,4096], index: 3, kind: output, shape index: {0}]   ;;  %s1947_s4 = inlined_call_operand.hbm [shape: f32[2,4096], index: 4, kind: output, shape index: {1}]  }
   0x1   :  { %11 = vsyncpa [#allocation6], 0 }
   0x2   :  { %12 = vsyncpa [#allocation4], 0  ;;  %s29_s17 = sshll.u32 %s1944_s1, 4  ;;  %s30_s17 = int_to_ptr.hbm [resolvable:$true] %s29_s17 }
   0x3   :  { %13 = vsyncpa [#allocation10], 0  ;;  %s1752_s18 = smov [#allocation5]   ;;  %s19_s22 = sshll.u32 %s1943_s0, 4  ;;  %s20_s22 = int_to_ptr.hbm [resolvable:$true] %s19_s22 }
   0x4   :  { %s31_s19 = sshll.u32 %s1752_s18, 4  ;;  %s1753_s23 = smov 2048   ;;  %s32_s19 = int_to_ptr.vmem [resolvable:$true] %s31_s19 }
   0x5   :  { %s1754_s24 = smov 128   ;;  %s1755_s25 = smov [#allocation2]  }
   0x6   :  { %37 = dma.hbm_to_vmem [thread:$0]  %s30_s17, 8192, %s32_s19, [#allocation6], %s1753_s23, %s1753_s23, %s1754_s24  }
   0x7   :  { %s21_s26 = sshll.u32 %s1755_s25, 4  ;;  %s43_s29 = sshll.u32 %s1945_s2, 4  ;;  %s22_s26 = int_to_ptr.vmem [resolvable:$true] %s21_s26  ;;  %s44_s29 = int_to_ptr.hbm [resolvable:$true] %s43_s29 }
   0x8   :  { %24 = dma.hbm_to_vmem [thread:$0]  %s20_s22, 32, %s22_s26, [#allocation3]  }
   0x9   :  { %s1756_s1 = smov [#allocation7]  }
   0xa   :  { %s45_s30 = sshll.u32 %s1756_s1, 4  ;;  %s46_s30 = int_to_ptr.vmem [resolvable:$true] %s45_s30 }
   0xb   :  { %48 = dma.hbm_to_vmem [thread:$0]  %s44_s29, 512, %s46_s30, [#allocation6]  }
   0xc   :  { %1744 = dma.done.wait [#allocation3], 32  }
   0xd   :  { %1745 = vsyncadd [#allocation3], 4294967264 }
   0xe   :  { %1746 = dma.done.wait [#allocation6], 8704  }
   0xf   :  { %1747 = vsyncadd [#allocation6], 4294958592  ;;  %vm520_vm0 = vcmask 261120   ;;  %v1331_v0 = vld [vmem:[#allocation5 + $0x100] sm:$0xf]  ;;  %vm996_vm1 = vcmask 1041408  }
  0x10   :  { %v1537_v1 = vld [vmem:[#allocation5 + $0x17c] sm:$0xf0]  ;;  %v1521_v2 = vld [vmem:[#allocation5 + $0x104] sm:$0xf]  ;;  %v1339_v5 = vld [vmem:[#allocation5 + $0x108] sm:$0xf] }
  0x11   :  { %v1332_v3 = vor.u32 %v1537_v1, %v1331_v0  ;;  %v1333_v4 = vld [vmem:[#allocation5 + $0x180] sm:$0xf0]  ;;  %v1538_v6 = vld [vmem:[#allocation5 + $0x184] sm:$0xf0]  ;;  %v1522_v9 = vld [vmem:[#allocation5 + $0x10c] sm:$0xf] }
  0x12   :  { %v1336_v7 = vor.u32 %v1521_v2, %v1333_v4  ;;  %v1340_v8 = vor.u32 %v1538_v6, %v1339_v5  ;;  %v1341_v10 = vld [vmem:[#allocation5 + $0x188] sm:$0xf0]  ;;  %v1203_v11 = vld [vmem:[#allocation5] sm:$0xf]  ;;  %v1489_v14 = vld [vmem:[#allocation5 + $0x4] sm:$0xf] }
  0x13   :  { %530 = vmatpush.bf16.msra.mxu0 %v1332_v3  ;;  %v1344_v12 = vor.u32 %v1522_v9, %v1341_v10  ;;  %v1505_v13 = vld [vmem:[#allocation5 + $0x7c] sm:$0xf0]  ;;  %v1205_v15 = vld [vmem:[#allocation5 + $0x80] sm:$0xf0]  ;;  %v1211_v18 = vld [vmem:[#allocation5 + $0x8] sm:$0xf] }
  0x14   :  { %543 = vmatpush.bf16.msra.mxu1 %v1336_v7  ;;  %556 = vmatpush.bf16.msra.mxu2 %v1340_v8  ;;  %v1204_v16 = vor.u32 %v1505_v13, %v1203_v11  ;;  %v1208_v17 = vor.u32 %v1489_v14, %v1205_v15  ;;  %v1506_v19 = vld [vmem:[#allocation5 + $0x84] sm:$0xf0]  ;;  %v1490_v20 = vld [vmem:[#allocation5 + $0xc] sm:$0xf]  ;;  %v62_v23 = vld [vmem:[#allocation2] sm:$0x3] }
  0x15   :  { %569 = vmatpush.bf16.msra.mxu3 %v1344_v12  ;;  %v1212_v21 = vor.u32 %v1506_v19, %v1211_v18  ;;  %v1213_v22 = vld [vmem:[#allocation5 + $0x88] sm:$0xf0]  ;;  %v1355_v24 = vld [vmem:[#allocation5 + $0x118] sm:$0xf]  ;;  %v1793_v26 = vpack.c.bf16 %v62_v23, %v62_v23  ;;  %v1524_v28 = vld [vmem:[#allocation5 + $0x11c] sm:$0xf] }
  0x16   :  { %v1216_v25 = vor.u32 %v1490_v20, %v1213_v22  ;;  %v1540_v27 = vld [vmem:[#allocation5 + $0x194] sm:$0xf0]  ;;  %v1357_v29 = vld [vmem:[#allocation5 + $0x198] sm:$0xf0]  ;;  %v1523_v32 = vld [vmem:[#allocation5 + $0x114] sm:$0xf] }
  0x17   :  { %531 = vmatpush.bf16.msra.mxu0 %v1204_v16  ;;  %v1356_v30 = vor.u32 %v1540_v27, %v1355_v24  ;;  %v1360_v31 = vor.u32 %v1524_v28, %v1357_v29  ;;  %v1349_v33 = vld [vmem:[#allocation5 + $0x190] sm:$0xf0]  ;;  %v1347_v34 = vld [vmem:[#allocation5 + $0x110] sm:$0xf]  ;;  %v1227_v37 = vld [vmem:[#allocation5 + $0x18] sm:$0xf] }
  0x18   :  { %544 = vmatpush.bf16.msra.mxu1 %v1208_v17  ;;  %557 = vmatpush.bf16.msra.mxu2 %v1212_v21  ;;  %v1352_v35 = vor.u32 %v1523_v32, %v1349_v33  ;;  %v1539_v36 = vld [vmem:[#allocation5 + $0x18c] sm:$0xf0]  ;;  %v1508_v38 = vld [vmem:[#allocation5 + $0x94] sm:$0xf0]  ;;  %v1492_v41 = vld [vmem:[#allocation5 + $0x1c] sm:$0xf] }
  0x19   :  { %570 = vmatpush.bf16.msra.mxu3 %v1216_v25  ;;  %v1348_v39 = vor.u32 %v1539_v36, %v1347_v34  ;;  %v1228_v40 = vor.u32 %v1508_v38, %v1227_v37  ;;  %v1229_v42 = vld [vmem:[#allocation5 + $0x98] sm:$0xf0]  ;;  %v1219_v43 = vld [vmem:[#allocation5 + $0x10] sm:$0xf]  ;;  %v1491_v46 = vld [vmem:[#allocation5 + $0x14] sm:$0xf] }
  0x1a   :  { %1457 = vmatmul.msk.bf16.vlgmr.msra.gmra.mxu0 %vm520_vm0, %v1793_v26  ;;  %v1232_v44 = vor.u32 %v1492_v41, %v1229_v42  ;;  %v1507_v45 = vld [vmem:[#allocation5 + $0x8c] sm:$0xf0]  ;;  %v1221_v47 = vld [vmem:[#allocation5 + $0x90] sm:$0xf0]  ;;  %v1371_v48 = vld [vmem:[#allocation5 + $0x128] sm:$0xf] }
  0x1b   :  { %1458 = vmatmul.msk.bf16.vlgmr.msra.gmra.mxu1 %vm520_vm0, %v1793_v26  ;;  %1459 = vmatmul.msk.bf16.vlgmr.msra.gmra.mxu2 %vm520_vm0, %v1793_v26  ;;  %v1542_v49 = vld [vmem:[#allocation5 + $0x1a4] sm:$0xf0]  ;;  %v1526_v50 = vld [vmem:[#allocation5 + $0x12c] sm:$0xf]  ;;  %v1224_v51 = vor.u32 %v1491_v46, %v1221_v47  ;;  %v1525_v54 = vld [vmem:[#allocation5 + $0x124] sm:$0xf]  ;;  %v1220_v56 = vor.u32 %v1507_v45, %v1219_v43 }
  0x1c   :  { %608 = vmatpush.bf16.msrb.mxu2 %v1356_v30  ;;  %1460 = vmatmul.msk.bf16.vlgmr.msra.gmra.mxu3 %vm520_vm0, %v1793_v26  ;;  %v1372_v52 = vor.u32 %v1542_v49, %v1371_v48  ;;  %v1373_v53 = vld [vmem:[#allocation5 + $0x1a8] sm:$0xf0]  ;;  %v1365_v55 = vld [vmem:[#allocation5 + $0x1a0] sm:$0xf0]  ;;  %v1363_v59 = vld [vmem:[#allocation5 + $0x120] sm:$0xf] }
  0x1d   :  { %621 = vmatpush.bf16.msrb.mxu3 %v1360_v31  ;;  %595 = vmatpush.bf16.msrb.mxu1 %v1352_v35  ;;  %v1376_v57 = vor.u32 %v1526_v50, %v1373_v53  ;;  %v1368_v58 = vor.u32 %v1525_v54, %v1365_v55  ;;  %v1541_v60 = vld [vmem:[#allocation5 + $0x19c] sm:$0xf0]  ;;  %v1243_v61 = vld [vmem:[#allocation5 + $0x28] sm:$0xf]  ;;  %v1494_v0 = vld [vmem:[#allocation5 + $0x2c] sm:$0xf] }
  0x1e   :  { %582 = vmatpush.bf16.msrb.mxu0 %v1348_v39  ;;  %v1364_v62 = vor.u32 %v1541_v60, %v1363_v59  ;;  %v1510_v63 = vld [vmem:[#allocation5 + $0xa4] sm:$0xf0]  ;;  %v1245_v1 = vld [vmem:[#allocation5 + $0xa8] sm:$0xf0]  ;;  %v1235_v4 = vld [vmem:[#allocation5 + $0x20] sm:$0xf] }
  0x1f   :  { %v1244_v2 = vor.u32 %v1510_v63, %v1243_v61  ;;  %v1248_v3 = vor.u32 %v1494_v0, %v1245_v1  ;;  %v1509_v5 = vld [vmem:[#allocation5 + $0x9c] sm:$0xf0]  ;;  %v1493_v6 = vld [vmem:[#allocation5 + $0x24] sm:$0xf]  ;;  %v1387_v10 = vld [vmem:[#allocation5 + $0x138] sm:$0xf] }
  0x20   :  { %609 = vmatpush.bf16.msrb.mxu2 %v1228_v40  ;;  %v1237_v7 = vld [vmem:[#allocation5 + $0xa0] sm:$0xf0]  ;;  %v1236_v9 = vor.u32 %v1509_v5, %v1235_v4  ;;  %v1544_v11 = vld [vmem:[#allocation5 + $0x1b4] sm:$0xf0]  ;;  %v1528_v12 = vld [vmem:[#allocation5 + $0x13c] sm:$0xf] }
  0x21   :  { %622 = vmatpush.bf16.msrb.mxu3 %v1232_v44  ;;  %596 = vmatpush.bf16.msrb.mxu1 %v1224_v51  ;;  %v1240_v8 = vor.u32 %v1493_v6, %v1237_v7  ;;  %v1389_v13 = vld [vmem:[#allocation5 + $0x1b8] sm:$0xf0]  ;;  %v1527_v14 = vld [vmem:[#allocation5 + $0x134] sm:$0xf]  ;;  %v1379_v16 = vld [vmem:[#allocation5 + $0x130] sm:$0xf]  ;;  %v1388_v18 = vor.u32 %v1544_v11, %v1387_v10 }
  0x22   :  { %583 = vmatpush.bf16.msrb.mxu0 %v1220_v56  ;;  %v1381_v15 = vld [vmem:[#allocation5 + $0x1b0] sm:$0xf0]  ;;  %v1543_v17 = vld [vmem:[#allocation5 + $0x1ac] sm:$0xf0]  ;;  %v1392_v19 = vor.u32 %v1528_v12, %v1389_v13  ;;  %v1259_v21 = vld [vmem:[#allocation5 + $0x38] sm:$0xf] }
  0x23   :  { %v1384_v20 = vor.u32 %v1527_v14, %v1381_v15  ;;  %v1512_v22 = vld [vmem:[#allocation5 + $0xb4] sm:$0xf0]  ;;  %v1496_v23 = vld [vmem:[#allocation5 + $0x3c] sm:$0xf]  ;;  %v1380_v24 = vor.u32 %v1543_v17, %v1379_v16  ;;  %v1495_v27 = vld [vmem:[#allocation5 + $0x34] sm:$0xf] }
  0x24   :  { %660 = vmatpush.bf16.msra.mxu2 %v1372_v52  ;;  %v1261_v25 = vld [vmem:[#allocation5 + $0xb8] sm:$0xf0]  ;;  %v1253_v28 = vld [vmem:[#allocation5 + $0xb0] sm:$0xf0]  ;;  %v1251_v29 = vld [vmem:[#allocation5 + $0x30] sm:$0xf]  ;;  %v1260_v31 = vor.u32 %v1512_v22, %v1259_v21 }
  0x25   :  { %673 = vmatpush.bf16.msra.mxu3 %v1376_v57  ;;  %647 = vmatpush.bf16.msra.mxu1 %v1368_v58  ;;  %v1511_v30 = vld [vmem:[#allocation5 + $0xac] sm:$0xf0]  ;;  %v1264_v32 = vor.u32 %v1496_v23, %v1261_v25  ;;  %v1256_v33 = vor.u32 %v1495_v27, %v1253_v28  ;;  %v1403_v35 = vld [vmem:[#allocation5 + $0x148] sm:$0xf]  ;;  %v1530_v37 = vld [vmem:[#allocation5 + $0x14c] sm:$0xf] }
  0x26   :  { %634 = vmatpush.bf16.msra.mxu0 %v1364_v62  ;;  %v1252_v34 = vor.u32 %v1511_v30, %v1251_v29  ;;  %v1546_v36 = vld [vmem:[#allocation5 + $0x1c4] sm:$0xf0]  ;;  %v1405_v38 = vld [vmem:[#allocation5 + $0x1c8] sm:$0xf0]  ;;  %v1529_v39 = vld [vmem:[#allocation5 + $0x144] sm:$0xf] }
  0x27   :  { %v1397_v40 = vld [vmem:[#allocation5 + $0x1c0] sm:$0xf0]  ;;  %v1395_v41 = vld [vmem:[#allocation5 + $0x140] sm:$0xf]  ;;  %v1404_v43 = vor.u32 %v1546_v36, %v1403_v35  ;;  %v1408_v44 = vor.u32 %v1530_v37, %v1405_v38  ;;  %v1275_v46 = vld [vmem:[#allocation5 + $0x48] sm:$0xf] }
  0x28   :  { %661 = vmatpush.bf16.msra.mxu2 %v1244_v2  ;;  %v1545_v42 = vld [vmem:[#allocation5 + $0x1bc] sm:$0xf0]  ;;  %v1400_v45 = vor.u32 %v1529_v39, %v1397_v40  ;;  %v1514_v47 = vld [vmem:[#allocation5 + $0xc4] sm:$0xf0]  ;;  %v1498_v48 = vld [vmem:[#allocation5 + $0x4c] sm:$0xf] }
  0x29   :  { %674 = vmatpush.bf16.msra.mxu3 %v1248_v3  ;;  %648 = vmatpush.bf16.msra.mxu1 %v1240_v8  ;;  %v1396_v49 = vor.u32 %v1545_v42, %v1395_v41  ;;  %v1277_v50 = vld [vmem:[#allocation5 + $0xc8] sm:$0xf0]  ;;  %v1497_v51 = vld [vmem:[#allocation5 + $0x44] sm:$0xf]  ;;  %v1267_v53 = vld [vmem:[#allocation5 + $0x40] sm:$0xf]  ;;  %v1276_v55 = vor.u32 %v1514_v47, %v1275_v46 }
  0x2a   :  { %635 = vmatpush.bf16.msra.mxu0 %v1236_v9  ;;  %v1269_v52 = vld [vmem:[#allocation5 + $0xc0] sm:$0xf0]  ;;  %v1513_v54 = vld [vmem:[#allocation5 + $0xbc] sm:$0xf0]  ;;  %v1280_v56 = vor.u32 %v1498_v48, %v1277_v50  ;;  %v1419_v59 = vld [vmem:[#allocation5 + $0x158] sm:$0xf] }
  0x2b   :  { %1461 = vmatmul.msk.bf16.vlgmr.msrb.gmra.mxu0 %vm520_vm0, %v1793_v26  ;;  %1462 = vmatmul.msk.bf16.vlgmr.msrb.gmra.mxu1 %vm520_vm0, %v1793_v26  ;;  %v1272_v57 = vor.u32 %v1497_v51, %v1269_v52  ;;  %v1268_v58 = vor.u32 %v1513_v54, %v1267_v53  ;;  %v1548_v60 = vld [vmem:[#allocation5 + $0x1d4] sm:$0xf0]  ;;  %v1532_v61 = vld [vmem:[#allocation5 + $0x15c] sm:$0xf]  ;;  %v1531_v63 = vld [vmem:[#allocation5 + $0x154] sm:$0xf] }
  0x2c   :  { %1463 = vmatmul.msk.bf16.vlgmr.msrb.gmra.mxu2 %vm520_vm0, %v1793_v26  ;;  %1464 = vmatmul.msk.bf16.vlgmr.msrb.gmra.mxu3 %vm520_vm0, %v1793_v26  ;;  %v1421_v62 = vld [vmem:[#allocation5 + $0x1d8] sm:$0xf0]  ;;  %v1413_v0 = vld [vmem:[#allocation5 + $0x1d0] sm:$0xf0]  ;;  %v1411_v1 = vld [vmem:[#allocation5 + $0x150] sm:$0xf]  ;;  %v1420_v3 = vor.u32 %v1548_v60, %v1419_v59 }
  0x2d   :  { %712 = vmatpush.bf16.msrb.mxu2 %v1388_v18  ;;  %725 = vmatpush.bf16.msrb.mxu3 %v1392_v19  ;;  %v1547_v2 = vld [vmem:[#allocation5 + $0x1cc] sm:$0xf0]  ;;  %v1424_v4 = vor.u32 %v1532_v61, %v1421_v62  ;;  %v1416_v5 = vor.u32 %v1531_v63, %v1413_v0  ;;  %v1291_v6 = vld [vmem:[#allocation5 + $0x58] sm:$0xf]  ;;  %v1500_v8 = vld [vmem:[#allocation5 + $0x5c] sm:$0xf] }
  0x2e   :  { %699 = vmatpush.bf16.msrb.mxu1 %v1384_v20  ;;  %686 = vmatpush.bf16.msrb.mxu0 %v1380_v24  ;;  %v1516_v7 = vld [vmem:[#allocation5 + $0xd4] sm:$0xf0]  ;;  %v1412_v9 = vor.u32 %v1547_v2, %v1411_v1  ;;  %v1293_v10 = vld [vmem:[#allocation5 + $0xd8] sm:$0xf0]  ;;  %v1499_v11 = vld [vmem:[#allocation5 + $0x54] sm:$0xf] }
  0x2f   :  { %v1285_v12 = vld [vmem:[#allocation5 + $0xd0] sm:$0xf0]  ;;  %v1283_v13 = vld [vmem:[#allocation5 + $0x50] sm:$0xf]  ;;  %v1292_v15 = vor.u32 %v1516_v7, %v1291_v6  ;;  %v1296_v16 = vor.u32 %v1500_v8, %v1293_v10  ;;  %v1435_v19 = vld [vmem:[#allocation5 + $0x168] sm:$0xf] }
  0x30   :  { %v1515_v14 = vld [vmem:[#allocation5 + $0xcc] sm:$0xf0]  ;;  %v1288_v17 = vor.u32 %v1499_v11, %v1285_v12  ;;  %v1550_v20 = vld [vmem:[#allocation5 + $0x1e4] sm:$0xf0]  ;;  %v1534_v21 = vld [vmem:[#allocation5 + $0x16c] sm:$0xf] }
  0x31   :  { %713 = vmatpush.bf16.msrb.mxu2 %v1260_v31  ;;  %726 = vmatpush.bf16.msrb.mxu3 %v1264_v32  ;;  %v1284_v18 = vor.u32 %v1515_v14, %v1283_v13  ;;  %v1437_v22 = vld [vmem:[#allocation5 + $0x1e8] sm:$0xf0]  ;;  %v1533_v23 = vld [vmem:[#allocation5 + $0x164] sm:$0xf]  ;;  %v1427_v25 = vld [vmem:[#allocation5 + $0x160] sm:$0xf]  ;;  %v1436_v28 = vor.u32 %v1550_v20, %v1435_v19 }
  0x32   :  { %700 = vmatpush.bf16.msrb.mxu1 %v1256_v33  ;;  %687 = vmatpush.bf16.msrb.mxu0 %v1252_v34  ;;  %v1429_v24 = vld [vmem:[#allocation5 + $0x1e0] sm:$0xf0]  ;;  %v1549_v27 = vld [vmem:[#allocation5 + $0x1dc] sm:$0xf0]  ;;  %v1440_v29 = vor.u32 %v1534_v21, %v1437_v22  ;;  %v1307_v31 = vld [vmem:[#allocation5 + $0x68] sm:$0xf] }
  0x33   :  { %v1432_v30 = vor.u32 %v1533_v23, %v1429_v24  ;;  %v1518_v32 = vld [vmem:[#allocation5 + $0xe4] sm:$0xf0]  ;;  %v1502_v33 = vld [vmem:[#allocation5 + $0x6c] sm:$0xf]  ;;  %v1428_v34 = vor.u32 %v1549_v27, %v1427_v25  ;;  %v1501_v36 = vld [vmem:[#allocation5 + $0x64] sm:$0xf] }
  0x34   :  { %v1309_v35 = vld [vmem:[#allocation5 + $0xe8] sm:$0xf0]  ;;  %v1301_v37 = vld [vmem:[#allocation5 + $0xe0] sm:$0xf0]  ;;  %v1299_v38 = vld [vmem:[#allocation5 + $0x60] sm:$0xf]  ;;  %v1308_v40 = vor.u32 %v1518_v32, %v1307_v31 }
  0x35   :  { %v1517_v39 = vld [vmem:[#allocation5 + $0xdc] sm:$0xf0]  ;;  %v1312_v41 = vor.u32 %v1502_v33, %v1309_v35  ;;  %v1304_v42 = vor.u32 %v1501_v36, %v1301_v37  ;;  %v1536_v46 = vld [vmem:[#allocation5 + $0x17c] sm:$0xf]  ;;  %v1535_v48 = vld [vmem:[#allocation5 + $0x174] sm:$0xf] }
  0x36   :  { %v1453_v47 = vld [vmem:[#allocation5 + $0x1f8] sm:$0xf0]  ;;  %v1443_v50 = vld [vmem:[#allocation5 + $0x170] sm:$0xf]  ;;  %v1503_v60 = vld [vmem:[#allocation5 + $0x74] sm:$0xf] }
  0x37   :  { %v1551_v51 = vld [vmem:[#allocation5 + $0x1ec] sm:$0xf0]  ;;  %v1456_v53 = vor.u32 %v1536_v46, %v1453_v47  ;;  %v1325_v59 = vld [vmem:[#allocation5 + $0xf8] sm:$0xf0]  ;;  %v1317_v61 = vld [vmem:[#allocation5 + $0xf0] sm:$0xf0] }
  0x38   :  { %v1315_v62 = vld [vmem:[#allocation5 + $0x70] sm:$0xf]  ;;  %v1320_v2 = vor.u32 %v1503_v60, %v1317_v61  ;;  %vm998_vm2 = vcmask 1045508   ;;  %vm1000_vm3 = vcmask 1043456   ;;  %s1757_s0 = smov [#allocation8]   ;;  %s1174_s7 = sshll.u32 %s1946_s3, 4  ;;  %s1175_s7 = int_to_ptr.hbm [resolvable:$true] %s1174_s7 }
  0x39   :  { %v1519_v63 = vld [vmem:[#allocation5 + $0xec] sm:$0xf0]  ;;  %s1172_s2 = sshll.u32 %s1757_s0, 4  ;;  %s1758_s3 = smov [#allocation9]   ;;  %s1173_s2 = int_to_ptr.vmem [resolvable:$true] %s1172_s2 }
  0x3a   :  { %s1183_s8 = sshll.u32 %s1758_s3, 4  ;;  %s1185_s11 = sshll.u32 %s1947_s4, 4  ;;  %s1184_s8 = int_to_ptr.vmem [resolvable:$true] %s1183_s8  ;;  %s1186_s11 = int_to_ptr.hbm [resolvable:$true] %s1185_s11 }
  0x3b   :  { %1465 = vmatmul.msk.bf16.vlgmr.msra.gmra.mxu0 %vm520_vm0, %v1793_v26  ;;  %1466 = vmatmul.msk.bf16.vlgmr.msra.gmra.mxu1 %vm520_vm0, %v1793_v26 }
  0x3c   :  { %1467 = vmatmul.msk.bf16.vlgmr.msra.gmra.mxu2 %vm520_vm0, %v1793_v26  ;;  %1468 = vmatmul.msk.bf16.vlgmr.msra.gmra.mxu3 %vm520_vm0, %v1793_v26 }
  0x3d   :  { %764 = vmatpush.bf16.msra.mxu2 %v1404_v43  ;;  %777 = vmatpush.bf16.msra.mxu3 %v1408_v44  ;;  %v1300_v43 = vor.u32 %v1517_v39, %v1299_v38  ;;  %v1451_v44 = vld [vmem:[#allocation5 + $0x178] sm:$0xf] }
  0x3e   :  { %751 = vmatpush.bf16.msra.mxu1 %v1400_v45  ;;  %738 = vmatpush.bf16.msra.mxu0 %v1396_v49  ;;  %v1552_v45 = vld [vmem:[#allocation5 + $0x1f4] sm:$0xf0]  ;;  %v1445_v49 = vld [vmem:[#allocation5 + $0x1f0] sm:$0xf0] }
  0x3f   :  { %v1452_v52 = vor.u32 %v1552_v45, %v1451_v44  ;;  %v1448_v54 = vor.u32 %v1535_v48, %v1445_v49 }
  0x41   :  { %765 = vmatpush.bf16.msra.mxu2 %v1276_v55  ;;  %778 = vmatpush.bf16.msra.mxu3 %v1280_v56  ;;  %v1323_v55 = vld [vmem:[#allocation5 + $0x78] sm:$0xf] }
  0x42   :  { %752 = vmatpush.bf16.msra.mxu1 %v1272_v57  ;;  %739 = vmatpush.bf16.msra.mxu0 %v1268_v58  ;;  %v1520_v56 = vld [vmem:[#allocation5 + $0xf4] sm:$0xf0]  ;;  %v1504_v57 = vld [vmem:[#allocation5 + $0x7c] sm:$0xf]  ;;  %v1444_v58 = vor.u32 %v1551_v51, %v1443_v50 }
  0x43   :  { %v1324_v0 = vor.u32 %v1520_v56, %v1323_v55  ;;  %v1328_v1 = vor.u32 %v1504_v57, %v1325_v59  ;;  %v1866_v56 = vld [vmem:[#allocation7 + $0x8] sm:$0xff] }
  0x44   :  { %v145_v60 = vperm.slane %v1866_v56, 1 }
  0x4b   :  { %1469 = vmatmul.msk.bf16.vlgmr.msrb.gmra.mxu0 %vm520_vm0, %v1793_v26  ;;  %1470 = vmatmul.msk.bf16.vlgmr.msrb.gmra.mxu1 %vm520_vm0, %v1793_v26 }
  0x4c   :  { %1471 = vmatmul.msk.bf16.vlgmr.msrb.gmra.mxu2 %vm520_vm0, %v1793_v26  ;;  %1472 = vmatmul.msk.bf16.vlgmr.msrb.gmra.mxu3 %vm520_vm0, %v1793_v26 }
  0x4d   :  { %816 = vmatpush.bf16.msrb.mxu2 %v1420_v3  ;;  %829 = vmatpush.bf16.msrb.mxu3 %v1424_v4  ;;  %v1316_v3 = vor.u32 %v1519_v63, %v1315_v62  ;;  %v128_v4 = vld [vmem:[#allocation7] sm:$0xff] }
  0x4e   :  { %803 = vmatpush.bf16.msrb.mxu1 %v1416_v5  ;;  %790 = vmatpush.bf16.msrb.mxu0 %v1412_v9  ;;  %v137_v5 = vperm.slane %v128_v4, 1  ;;  %v136_v7 = vperm.slane %v128_v4, 0  ;;  %v138_v10 = vperm.slane %v128_v4, 2  ;;  %v139_v12 = vperm.slane %v128_v4, 3 }
  0x4f   :  { %v141_v27 = vperm.slane %v128_v4, 5  ;;  %v140_v35 = vperm.slane %v128_v4, 4  ;;  %v143_v44 = vperm.slane %v128_v4, 7 }
  0x51   :  { %817 = vmatpush.bf16.msrb.mxu2 %v1292_v15  ;;  %830 = vmatpush.bf16.msrb.mxu3 %v1296_v16 }
  0x52   :  { %804 = vmatpush.bf16.msrb.mxu1 %v1288_v17  ;;  %791 = vmatpush.bf16.msrb.mxu0 %v1284_v18 }
  0x5b   :  { %1473 = vmatmul.msk.bf16.vlgmr.msra.gmra.mxu0 %vm520_vm0, %v1793_v26  ;;  %1474 = vmatmul.msk.bf16.vlgmr.msra.gmra.mxu1 %vm520_vm0, %v1793_v26 }
  0x5c   :  { %1475 = vmatmul.msk.bf16.vlgmr.msra.gmra.mxu2 %vm520_vm0, %v1793_v26  ;;  %1476 = vmatmul.msk.bf16.vlgmr.msra.gmra.mxu3 %vm520_vm0, %v1793_v26 }
  0x5d   :  { %868 = vmatpush.bf16.msra.mxu2 %v1436_v28  ;;  %881 = vmatpush.bf16.msra.mxu3 %v1440_v29 }
  0x5e   :  { %855 = vmatpush.bf16.msra.mxu1 %v1432_v30  ;;  %842 = vmatpush.bf16.msra.mxu0 %v1428_v34 }
  0x61   :  { %869 = vmatpush.bf16.msra.mxu2 %v1308_v40  ;;  %882 = vmatpush.bf16.msra.mxu3 %v1312_v41  ;;  %v142_v41 = vperm.slane %v128_v4, 6  ;;  %v144_v4 = vperm.slane %v1866_v56, 0 }
  0x62   :  { %856 = vmatpush.bf16.msra.mxu1 %v1304_v42  ;;  %843 = vmatpush.bf16.msra.mxu0 %v1300_v43 }
  0x6b   :  { %1477 = vmatmul.msk.bf16.vlgmr.msrb.gmra.mxu0 %vm520_vm0, %v1793_v26  ;;  %1478 = vmatmul.msk.bf16.vlgmr.msrb.gmra.mxu1 %vm520_vm0, %v1793_v26 }
  0x6c   :  { %1479 = vmatmul.msk.bf16.vlgmr.msrb.gmra.mxu2 %vm520_vm0, %v1793_v26  ;;  %1480 = vmatmul.msk.bf16.vlgmr.msrb.gmra.mxu3 %vm520_vm0, %v1793_v26 }
  0x6d   :  { %920 = vmatpush.bf16.msrb.mxu2 %v1452_v52  ;;  %933 = vmatpush.bf16.msrb.mxu3 %v1456_v53 }
  0x6e   :  { %907 = vmatpush.bf16.msrb.mxu1 %v1448_v54  ;;  %894 = vmatpush.bf16.msrb.mxu0 %v1444_v58 }
  0x71   :  { %921 = vmatpush.bf16.msrb.mxu2 %v1324_v0  ;;  %934 = vmatpush.bf16.msrb.mxu3 %v1328_v1 }
  0x72   :  { %908 = vmatpush.bf16.msrb.mxu1 %v1320_v2  ;;  %895 = vmatpush.bf16.msrb.mxu0 %v1316_v3 }
  0x7b   :  { %1481 = vmatmul.msk.bf16.vlgmr.msra.gmra.mxu0 %vm520_vm0, %v1793_v26  ;;  %1482 = vmatmul.msk.bf16.vlgmr.msra.gmra.mxu1 %vm520_vm0, %v1793_v26 }
  0x7c   :  { %1483 = vmatmul.msk.bf16.vlgmr.msra.gmra.mxu2 %vm520_vm0, %v1793_v26  ;;  %1484 = vmatmul.msk.bf16.vlgmr.msra.gmra.mxu3 %vm520_vm0, %v1793_v26 }
  0x8b   :  { %1485 = vmatmul.msk.bf16.vlgmr.msrb.gmra.mxu0 %vm520_vm0, %v1793_v26  ;;  %1486 = vmatmul.msk.bf16.vlgmr.msrb.gmra.mxu1 %vm520_vm0, %v1793_v26 }
  0x8c   :  { %1487 = vmatmul.msk.bf16.vlgmr.msrb.gmra.mxu2 %vm520_vm0, %v1793_v26  ;;  %1488 = vmatmul.msk.bf16.vlgmr.msrb.gmra.mxu3 %vm520_vm0, %v1793_v26 }
  0x97   :  { %v533_v6 = vpop.f32.mrf.mxu0 }
  0x98   :  { %v546_v8 = vpop.f32.mrf.mxu1  ;;  %v534_v11 = vadd.f32 %v533_v6, %v136_v7 }
  0x99   :  { %v547_v9 = vadd.f32 %v546_v8, %v137_v5 }
  0x9b   :  { %1560 = vtanh.f32 %v547_v9  ;;  %v972_v13 = vrot.slane %v547_v9, 6 }
  0x9c   :  { %1562 = vtanh.f32 %v534_v11 }
  0x9d   :  { %v997_v21 = vsel %vm996_vm1, %v534_v11, %v972_v13  ;;  %v147_v13 = vperm.slane %v1866_v56, 3 }
  0x9e   :  { %v559_v14 = vpop.f32.mrf.mxu2 }
  0x9f   :  { %v560_v15 = vadd.f32 %v559_v14, %v138_v10  ;;  %v572_v16 = vpop.f32.mrf.mxu3  ;;  %v535_v17 = vpop.f32.mrf.mxu0  ;;  %v146_v10 = vperm.slane %v1866_v56, 2 }
  0xa0   :  { %v573_v18 = vadd.f32 %v572_v16, %v139_v12  ;;  %v548_v19 = vpop.f32.mrf.mxu1 }
  0xa1   :  { %v973_v26 = vrot.slane %v560_v15, 4  ;;  %1564 = vtanh.f32 %v560_v15  ;;  %v1561_v20 = vpop.eup %1560 }
  0xa2   :  { %v974_v22 = vrot.slane %v573_v18, 2  ;;  %1566 = vtanh.f32 %v573_v18  ;;  %v1103_v24 = vrot.slane %v1561_v20, 6  ;;  %v1563_v28 = vpop.eup %1562 }
  0xa4   :  { %v999_v23 = vsel %vm998_vm2, %v973_v26, %v974_v22  ;;  %v1127_v37 = vsel %vm996_vm1, %v1563_v28, %v1103_v24  ;;  %v149_v28 = vperm.slane %v1866_v56, 5 }
  0xa5   :  { %v1001_v25 = vsel %vm1000_vm3, %v997_v21, %v999_v23 }
  0xa6   :  { %1031 = vst [vmem:[#allocation8] sm:$0xff] %v1001_v25  ;;  %v561_v29 = vpop.f32.mrf.mxu2 }
  0xa7   :  { %v1565_v30 = vpop.eup %1564  ;;  %v574_v31 = vpop.f32.mrf.mxu3 }
  0xa8   :  { %v585_v32 = vpop.f32.mrf.mxu0  ;;  %v1567_v33 = vpop.eup %1566  ;;  %v1104_v34 = vrot.slane %v1565_v30, 4 }
  0xa9   :  { %v598_v36 = vpop.f32.mrf.mxu1  ;;  %v1105_v38 = vrot.slane %v1567_v33, 2  ;;  %v586_v43 = vadd.f32 %v585_v32, %v140_v35 }
  0xaa   :  { %v599_v39 = vadd.f32 %v598_v36, %v141_v27  ;;  %v148_v36 = vperm.slane %v1866_v56, 4 }
  0xab   :  { %v1128_v40 = vsel %vm998_vm2, %v1104_v34, %v1105_v38 }
  0xac   :  { %v1129_v42 = vsel %vm1000_vm3, %v1127_v37, %v1128_v40  ;;  %1568 = vtanh.f32 %v599_v39  ;;  %v975_v45 = vrot.slane %v599_v39, 6 }
  0xad   :  { %1159 = vst [vmem:[#allocation9] sm:$0xff] %v1129_v42  ;;  %1570 = vtanh.f32 %v586_v43  ;;  %v150_v42 = vperm.slane %v1866_v56, 6 }
  0xae   :  { %v1002_v54 = vsel %vm996_vm1, %v586_v43, %v975_v45  ;;  %v151_v45 = vperm.slane %v1866_v56, 7 }
  0xaf   :  { %v611_v46 = vpop.f32.mrf.mxu2  ;;  %v624_v48 = vpop.f32.mrf.mxu3 }
  0xb0   :  { %v612_v47 = vadd.f32 %v611_v46, %v142_v41  ;;  %v587_v49 = vpop.f32.mrf.mxu0  ;;  %v625_v50 = vadd.f32 %v624_v48, %v143_v44 }
  0xb1   :  { %v600_v51 = vpop.f32.mrf.mxu1 }
  0xb2   :  { %v976_v52 = vrot.slane %v612_v47, 4  ;;  %1572 = vtanh.f32 %v612_v47  ;;  %v1569_v53 = vpop.eup %1568  ;;  %v977_v55 = vrot.slane %v625_v50, 2 }
  0xb3   :  { %1574 = vtanh.f32 %v625_v50  ;;  %v1106_v58 = vrot.slane %v1569_v53, 6  ;;  %v1571_v61 = vpop.eup %1570 }
  0xb4   :  { %v1003_v57 = vsel %vm998_vm2, %v976_v52, %v977_v55 }
  0xb5   :  { %v1004_v59 = vsel %vm1000_vm3, %v1002_v54, %v1003_v57  ;;  %v1130_v6 = vsel %vm996_vm1, %v1571_v61, %v1106_v58  ;;  %v1888_v58 = vld [vmem:[#allocation7 + $0x10] sm:$0xff] }
  0xb6   :  { %1032 = vst [vmem:[#allocation8 + $0x8] sm:$0xff] %v1004_v59  ;;  %v153_v61 = vperm.slane %v1888_v58, 1 }
  0xb7   :  { %v613_v62 = vpop.f32.mrf.mxu2  ;;  %v626_v0 = vpop.f32.mrf.mxu3 }
  0xb8   :  { %v1573_v63 = vpop.eup %1572  ;;  %v637_v1 = vpop.f32.mrf.mxu0 }
  0xb9   :  { %v1575_v2 = vpop.eup %1574  ;;  %v1107_v3 = vrot.slane %v1573_v63, 4  ;;  %v650_v5 = vpop.f32.mrf.mxu1  ;;  %v638_v12 = vadd.f32 %v637_v1, %v144_v4 }
  0xba   :  { %v1108_v7 = vrot.slane %v1575_v2, 2  ;;  %v651_v8 = vadd.f32 %v650_v5, %v145_v60  ;;  %v152_v5 = vperm.slane %v1888_v58, 0 }
  0xbc   :  { %v1131_v9 = vsel %vm998_vm2, %v1107_v3, %v1108_v7  ;;  %1576 = vtanh.f32 %v651_v8  ;;  %v978_v14 = vrot.slane %v651_v8, 6 }
  0xbd   :  { %v1132_v11 = vsel %vm1000_vm3, %v1130_v6, %v1131_v9  ;;  %1578 = vtanh.f32 %v638_v12 }
  0xbe   :  { %1160 = vst [vmem:[#allocation9 + $0x8] sm:$0xff] %v1132_v11  ;;  %v1005_v22 = vsel %vm996_vm1, %v638_v12, %v978_v14  ;;  %v154_v11 = vperm.slane %v1888_v58, 2  ;;  %v155_v14 = vperm.slane %v1888_v58, 3 }
  0xbf   :  { %v663_v15 = vpop.f32.mrf.mxu2  ;;  %v676_v17 = vpop.f32.mrf.mxu3 }
  0xc0   :  { %v664_v16 = vadd.f32 %v663_v15, %v146_v10  ;;  %v639_v18 = vpop.f32.mrf.mxu0  ;;  %v677_v19 = vadd.f32 %v676_v17, %v147_v13 }
  0xc1   :  { %v652_v26 = vpop.f32.mrf.mxu1 }
  0xc2   :  { %v979_v20 = vrot.slane %v664_v16, 4  ;;  %1580 = vtanh.f32 %v664_v16  ;;  %v1577_v21 = vpop.eup %1576  ;;  %v980_v23 = vrot.slane %v677_v19, 2 }
  0xc3   :  { %1582 = vtanh.f32 %v677_v19  ;;  %v1109_v25 = vrot.slane %v1577_v21, 6  ;;  %v1579_v29 = vpop.eup %1578 }
  0xc4   :  { %v1006_v24 = vsel %vm998_vm2, %v979_v20, %v980_v23 }
  0xc5   :  { %v1007_v27 = vsel %vm1000_vm3, %v1005_v22, %v1006_v24  ;;  %v1133_v38 = vsel %vm996_vm1, %v1579_v29, %v1109_v25  ;;  %v157_v29 = vperm.slane %v1888_v58, 5 }
  0xc6   :  { %1033 = vst [vmem:[#allocation8 + $0x10] sm:$0xff] %v1007_v27 }
  0xc7   :  { %v665_v30 = vpop.f32.mrf.mxu2  ;;  %v678_v32 = vpop.f32.mrf.mxu3 }
  0xc8   :  { %v1581_v31 = vpop.eup %1580  ;;  %v689_v33 = vpop.f32.mrf.mxu0 }
  0xc9   :  { %v1583_v34 = vpop.eup %1582  ;;  %v1110_v35 = vrot.slane %v1581_v31, 4  ;;  %v702_v37 = vpop.f32.mrf.mxu1  ;;  %v690_v44 = vadd.f32 %v689_v33, %v148_v36 }
  0xca   :  { %v1111_v39 = vrot.slane %v1583_v34, 2  ;;  %v703_v40 = vadd.f32 %v702_v37, %v149_v28  ;;  %v156_v37 = vperm.slane %v1888_v58, 4 }
  0xcc   :  { %v1134_v41 = vsel %vm998_vm2, %v1110_v35, %v1111_v39  ;;  %1584 = vtanh.f32 %v703_v40  ;;  %v981_v46 = vrot.slane %v703_v40, 6 }
  0xcd   :  { %v1135_v43 = vsel %vm1000_vm3, %v1133_v38, %v1134_v41  ;;  %1586 = vtanh.f32 %v690_v44 }
  0xce   :  { %1161 = vst [vmem:[#allocation9 + $0x10] sm:$0xff] %v1135_v43  ;;  %v1008_v55 = vsel %vm996_vm1, %v690_v44, %v981_v46  ;;  %v158_v43 = vperm.slane %v1888_v58, 6  ;;  %v159_v46 = vperm.slane %v1888_v58, 7 }
  0xcf   :  { %v715_v47 = vpop.f32.mrf.mxu2  ;;  %v728_v49 = vpop.f32.mrf.mxu3 }
  0xd0   :  { %v716_v48 = vadd.f32 %v715_v47, %v150_v42  ;;  %v691_v50 = vpop.f32.mrf.mxu0  ;;  %v729_v51 = vadd.f32 %v728_v49, %v151_v45 }
  0xd1   :  { %v704_v52 = vpop.f32.mrf.mxu1 }
  0xd2   :  { %v982_v53 = vrot.slane %v716_v48, 4  ;;  %1588 = vtanh.f32 %v716_v48  ;;  %v1585_v54 = vpop.eup %1584  ;;  %v983_v57 = vrot.slane %v729_v51, 2 }
  0xd3   :  { %1590 = vtanh.f32 %v729_v51  ;;  %v1112_v59 = vrot.slane %v1585_v54, 6  ;;  %v1587_v62 = vpop.eup %1586 }
  0xd4   :  { %v1009_v56 = vsel %vm998_vm2, %v982_v53, %v983_v57 }
  0xd5   :  { %v1010_v60 = vsel %vm1000_vm3, %v1008_v55, %v1009_v56  ;;  %v1136_v7 = vsel %vm996_vm1, %v1587_v62, %v1112_v59  ;;  %v1910_v59 = vld [vmem:[#allocation7 + $0x18] sm:$0xff] }
  0xd6   :  { %1034 = vst [vmem:[#allocation8 + $0x18] sm:$0xff] %v1010_v60  ;;  %v161_v62 = vperm.slane %v1910_v59, 1 }
  0xd7   :  { %v717_v63 = vpop.f32.mrf.mxu2  ;;  %v730_v1 = vpop.f32.mrf.mxu3 }
  0xd8   :  { %v1589_v0 = vpop.eup %1588  ;;  %v741_v2 = vpop.f32.mrf.mxu0 }
  0xd9   :  { %v1591_v3 = vpop.eup %1590  ;;  %v1113_v4 = vrot.slane %v1589_v0, 4  ;;  %v754_v6 = vpop.f32.mrf.mxu1  ;;  %v742_v13 = vadd.f32 %v741_v2, %v152_v5 }
  0xda   :  { %v1114_v8 = vrot.slane %v1591_v3, 2  ;;  %v755_v9 = vadd.f32 %v754_v6, %v153_v61  ;;  %v160_v6 = vperm.slane %v1910_v59, 0 }
  0xdc   :  { %v1137_v10 = vsel %vm998_vm2, %v1113_v4, %v1114_v8  ;;  %1592 = vtanh.f32 %v755_v9  ;;  %v984_v15 = vrot.slane %v755_v9, 6 }
  0xdd   :  { %v1138_v12 = vsel %vm1000_vm3, %v1136_v7, %v1137_v10  ;;  %1594 = vtanh.f32 %v742_v13 }
  0xde   :  { %1162 = vst [vmem:[#allocation9 + $0x18] sm:$0xff] %v1138_v12  ;;  %v1011_v23 = vsel %vm996_vm1, %v742_v13, %v984_v15  ;;  %v162_v12 = vperm.slane %v1910_v59, 2  ;;  %v163_v15 = vperm.slane %v1910_v59, 3 }
  0xdf   :  { %v767_v16 = vpop.f32.mrf.mxu2  ;;  %v780_v18 = vpop.f32.mrf.mxu3 }
  0xe0   :  { %v768_v17 = vadd.f32 %v767_v16, %v154_v11  ;;  %v743_v19 = vpop.f32.mrf.mxu0  ;;  %v781_v26 = vadd.f32 %v780_v18, %v155_v14 }
  0xe1   :  { %v756_v20 = vpop.f32.mrf.mxu1 }
  0xe2   :  { %v985_v21 = vrot.slane %v768_v17, 4  ;;  %1596 = vtanh.f32 %v768_v17  ;;  %v1593_v22 = vpop.eup %1592  ;;  %v986_v24 = vrot.slane %v781_v26, 2 }
  0xe3   :  { %1598 = vtanh.f32 %v781_v26  ;;  %v1115_v27 = vrot.slane %v1593_v22, 6  ;;  %v1595_v30 = vpop.eup %1594 }
  0xe4   :  { %v1012_v25 = vsel %vm998_vm2, %v985_v21, %v986_v24 }
  0xe5   :  { %v1013_v28 = vsel %vm1000_vm3, %v1011_v23, %v1012_v25  ;;  %v1139_v39 = vsel %vm996_vm1, %v1595_v30, %v1115_v27  ;;  %v165_v30 = vperm.slane %v1910_v59, 5 }
  0xe6   :  { %1035 = vst [vmem:[#allocation8 + $0x20] sm:$0xff] %v1013_v28 }
  0xe7   :  { %v769_v31 = vpop.f32.mrf.mxu2  ;;  %v782_v33 = vpop.f32.mrf.mxu3 }
  0xe8   :  { %v1597_v32 = vpop.eup %1596  ;;  %v793_v34 = vpop.f32.mrf.mxu0 }
  0xe9   :  { %v1599_v35 = vpop.eup %1598  ;;  %v1116_v36 = vrot.slane %v1597_v32, 4  ;;  %v806_v38 = vpop.f32.mrf.mxu1  ;;  %v794_v45 = vadd.f32 %v793_v34, %v156_v37 }
  0xea   :  { %v1117_v40 = vrot.slane %v1599_v35, 2  ;;  %v807_v41 = vadd.f32 %v806_v38, %v157_v29  ;;  %v164_v38 = vperm.slane %v1910_v59, 4 }
  0xec   :  { %v1140_v42 = vsel %vm998_vm2, %v1116_v36, %v1117_v40  ;;  %1600 = vtanh.f32 %v807_v41  ;;  %v987_v47 = vrot.slane %v807_v41, 6 }
  0xed   :  { %v1141_v44 = vsel %vm1000_vm3, %v1139_v39, %v1140_v42  ;;  %1602 = vtanh.f32 %v794_v45 }
  0xee   :  { %1163 = vst [vmem:[#allocation9 + $0x20] sm:$0xff] %v1141_v44  ;;  %v1014_v57 = vsel %vm996_vm1, %v794_v45, %v987_v47  ;;  %v166_v44 = vperm.slane %v1910_v59, 6  ;;  %v167_v47 = vperm.slane %v1910_v59, 7 }
  0xef   :  { %v819_v48 = vpop.f32.mrf.mxu2  ;;  %v832_v50 = vpop.f32.mrf.mxu3 }
  0xf0   :  { %v820_v49 = vadd.f32 %v819_v48, %v158_v43  ;;  %v795_v51 = vpop.f32.mrf.mxu0  ;;  %v833_v52 = vadd.f32 %v832_v50, %v159_v46 }
  0xf1   :  { %v808_v53 = vpop.f32.mrf.mxu1 }
  0xf2   :  { %v988_v54 = vrot.slane %v820_v49, 4  ;;  %1604 = vtanh.f32 %v820_v49  ;;  %v1601_v55 = vpop.eup %1600  ;;  %v989_v56 = vrot.slane %v833_v52, 2 }
  0xf3   :  { %1606 = vtanh.f32 %v833_v52  ;;  %v1118_v60 = vrot.slane %v1601_v55, 6  ;;  %v1603_v63 = vpop.eup %1602 }
  0xf4   :  { %v1015_v58 = vsel %vm998_vm2, %v988_v54, %v989_v56 }
  0xf5   :  { %v1016_v61 = vsel %vm1000_vm3, %v1014_v57, %v1015_v58  ;;  %v1142_v8 = vsel %vm996_vm1, %v1603_v63, %v1118_v60 }
  0xf6   :  { %1036 = vst [vmem:[#allocation8 + $0x28] sm:$0xff] %v1016_v61 }
  0xf7   :  { %v821_v0 = vpop.f32.mrf.mxu2  ;;  %v834_v2 = vpop.f32.mrf.mxu3 }
  0xf8   :  { %v1605_v1 = vpop.eup %1604  ;;  %v845_v3 = vpop.f32.mrf.mxu0 }
  0xf9   :  { %v1607_v4 = vpop.eup %1606  ;;  %v1119_v5 = vrot.slane %v1605_v1, 4  ;;  %v858_v7 = vpop.f32.mrf.mxu1  ;;  %v846_v14 = vadd.f32 %v845_v3, %v160_v6 }
  0xfa   :  { %v1120_v9 = vrot.slane %v1607_v4, 2  ;;  %v859_v10 = vadd.f32 %v858_v7, %v161_v62 }
  0xfc   :  { %v1143_v11 = vsel %vm998_vm2, %v1119_v5, %v1120_v9  ;;  %1608 = vtanh.f32 %v859_v10  ;;  %v990_v16 = vrot.slane %v859_v10, 6 }
  0xfd   :  { %v1144_v13 = vsel %vm1000_vm3, %v1142_v8, %v1143_v11  ;;  %1610 = vtanh.f32 %v846_v14 }
  0xfe   :  { %1164 = vst [vmem:[#allocation9 + $0x28] sm:$0xff] %v1144_v13  ;;  %v1017_v24 = vsel %vm996_vm1, %v846_v14, %v990_v16 }
  0xff   :  { %v871_v17 = vpop.f32.mrf.mxu2  ;;  %v884_v19 = vpop.f32.mrf.mxu3 }
 0x100   :  { %v872_v18 = vadd.f32 %v871_v17, %v162_v12  ;;  %v847_v26 = vpop.f32.mrf.mxu0  ;;  %v885_v20 = vadd.f32 %v884_v19, %v163_v15 }
 0x101   :  { %v860_v21 = vpop.f32.mrf.mxu1 }
 0x102   :  { %v991_v22 = vrot.slane %v872_v18, 4  ;;  %1612 = vtanh.f32 %v872_v18  ;;  %v1609_v23 = vpop.eup %1608  ;;  %v992_v25 = vrot.slane %v885_v20, 2 }
 0x103   :  { %1614 = vtanh.f32 %v885_v20  ;;  %v1121_v28 = vrot.slane %v1609_v23, 6  ;;  %v1611_v31 = vpop.eup %1610 }
 0x104   :  { %v1018_v27 = vsel %vm998_vm2, %v991_v22, %v992_v25 }
 0x105   :  { %v1019_v29 = vsel %vm1000_vm3, %v1017_v24, %v1018_v27  ;;  %v1145_v40 = vsel %vm996_vm1, %v1611_v31, %v1121_v28 }
 0x106   :  { %1037 = vst [vmem:[#allocation8 + $0x30] sm:$0xff] %v1019_v29 }
 0x107   :  { %v873_v32 = vpop.f32.mrf.mxu2  ;;  %v886_v34 = vpop.f32.mrf.mxu3 }
 0x108   :  { %v1613_v33 = vpop.eup %1612  ;;  %v897_v35 = vpop.f32.mrf.mxu0 }
 0x109   :  { %v1615_v36 = vpop.eup %1614  ;;  %v1122_v37 = vrot.slane %v1613_v33, 4  ;;  %v910_v39 = vpop.f32.mrf.mxu1  ;;  %v898_v46 = vadd.f32 %v897_v35, %v164_v38 }
 0x10a   :  { %v1123_v41 = vrot.slane %v1615_v36, 2  ;;  %v911_v42 = vadd.f32 %v910_v39, %v165_v30 }
 0x10c   :  { %v1146_v43 = vsel %vm998_vm2, %v1122_v37, %v1123_v41  ;;  %1616 = vtanh.f32 %v911_v42  ;;  %v993_v48 = vrot.slane %v911_v42, 6 }
 0x10d   :  { %v1147_v45 = vsel %vm1000_vm3, %v1145_v40, %v1146_v43  ;;  %1618 = vtanh.f32 %v898_v46 }
 0x10e   :  { %1165 = vst [vmem:[#allocation9 + $0x30] sm:$0xff] %v1147_v45  ;;  %v1020_v56 = vsel %vm996_vm1, %v898_v46, %v993_v48 }
 0x10f   :  { %v923_v49 = vpop.f32.mrf.mxu2  ;;  %v936_v51 = vpop.f32.mrf.mxu3 }
 0x110   :  { %v924_v50 = vadd.f32 %v923_v49, %v166_v44  ;;  %v899_v52 = vpop.f32.mrf.mxu0  ;;  %v937_v53 = vadd.f32 %v936_v51, %v167_v47 }
 0x111   :  { %v912_v54 = vpop.f32.mrf.mxu1 }
 0x112   :  { %v994_v55 = vrot.slane %v924_v50, 4  ;;  %1620 = vtanh.f32 %v924_v50  ;;  %v1617_v57 = vpop.eup %1616  ;;  %v995_v59 = vrot.slane %v937_v53, 2 }
 0x113   :  { %1622 = vtanh.f32 %v937_v53  ;;  %v1124_v60 = vrot.slane %v1617_v57, 6  ;;  %v1619_v62 = vpop.eup %1618 }
 0x114   :  { %v1021_v58 = vsel %vm998_vm2, %v994_v55, %v995_v59 }
 0x115   :  { %v1022_v61 = vsel %vm1000_vm3, %v1020_v56, %v1021_v58  ;;  %v1148_v4 = vsel %vm996_vm1, %v1619_v62, %v1124_v60 }
 0x116   :  { %1038 = vst [vmem:[#allocation8 + $0x38] sm:$0xff] %v1022_v61 }
 0x117   :  { %v925_v63 = vpop.f32.mrf.mxu2  ;;  %v938_v1 = vpop.f32.mrf.mxu3  ;;  %1177 = dma.vmem_to_hbm [thread:$0]  %s1173_s2, 1024, %s1175_s7, [#allocation4]  }
 0x118   :  { %v1621_v0 = vpop.eup %1620 }
 0x119   :  { %v1623_v2 = vpop.eup %1622  ;;  %v1125_v3 = vrot.slane %v1621_v0, 4 }
 0x11a   :  { %v1126_v5 = vrot.slane %v1623_v2, 2 }
 0x11c   :  { %v1149_v6 = vsel %vm998_vm2, %v1125_v3, %v1126_v5 }
 0x11d   :  { %v1150_v7 = vsel %vm1000_vm3, %v1148_v4, %v1149_v6 }
 0x11e   :  { %1166 = vst [vmem:[#allocation9 + $0x38] sm:$0xff] %v1150_v7 }
 0x11f   :  { %1188 = dma.vmem_to_hbm [thread:$0]  %s1184_s8, 1024, %s1186_s11, [#allocation10]  }
 0x120   :  { %1748 = dma.done.wait [#allocation4], 1024  }
 0x121   :  { %1749 = vsyncadd [#allocation4], 4294966272 }
 0x122   :  { %1750 = dma.done.wait [#allocation10], 1024  }
 0x123   :  { %1751 = vsyncadd [#allocation10], 4294966272 }
 0x124   :  { %1197 = vsyncpa [#allocation3], 1 }
 0x125   :  { %1198 = vsyncpa [#allocation6], 1 }
 0x126   :  { %1199 = vsyncpa [#allocation4], 1 }
 0x127   :  { %1200 = vsyncpa [#allocation10], 1 }

</bundles_post_ra>
